<compile_context>
chip_gen: v7x
topology: tpu7x:2x2x1
jax: 0.10.0
libtpu: 0.0.40
codegen_flags: <defaults>
</compile_context>

<pallas_src>
import functools

import jax
import jax.numpy as jnp
from jax import lax
from jax.experimental import pallas as pl
from jax.experimental.pallas import tpu as pltpu


def _offset_pos_kernel(pred_ref, label_ref, loss_out_ref, mask_out_ref,
                       loss_acc, mask_acc, *,
                       N, HW, TB, HW_C, n_b, n_c, mask_rows, mask_cols):
    # pred_ref      : (TB, 2, HW_C) VMEM — predicted offsets
    # label_ref     : (TB, 3, HW_C) VMEM — [target_x, target_y, pos_weight]
    # loss_out_ref  : (1, 1, 1)     VMEM — per-parallel-slice loss partial
    # mask_out_ref  : (1, 1, 1)     VMEM — per-parallel-slice weight partial
    # loss_acc/mask_acc : (1, 1) f32 VMEM scratch — running scalar sums
    p = pl.program_id(0)   # parallel slice (TensorCore split)
    i = pl.program_id(1)   # row-tile within slice
    j = pl.program_id(2)   # lane (HW) tile

    @pl.when((i == 0) & (j == 0))
    def _init():
        loss_acc[...] = jnp.zeros_like(loss_acc)
        mask_acc[...] = jnp.zeros_like(mask_acc)

    # Channel slices taken directly from the fused label/pred tiles.
    p0 = pred_ref[:, 0, :].astype(jnp.float32)   # (TB, HW_C)
    p1 = pred_ref[:, 1, :].astype(jnp.float32)
    t0 = label_ref[:, 0, :].astype(jnp.float32)
    t1 = label_ref[:, 1, :].astype(jnp.float32)
    w = label_ref[:, 2, :].astype(jnp.float32)

    # SmoothL1 with beta = 1.0 (PyTorch default), reduction='none', channel-summed.
    d0 = p0 - t0
    d1 = p1 - t1
    a0 = jnp.abs(d0)
    a1 = jnp.abs(d1)
    s0 = jnp.where(a0 < 1.0, 0.5 * d0 * d0, a0 - 0.5)
    s1 = jnp.where(a1 < 1.0, 0.5 * d1 * d1, a1 - 0.5)
    sl1_sum = s0 + s1                            # (TB, HW_C)

    num = w * sl1_sum
    if mask_rows or mask_cols:
        valid = None
        if mask_rows:
            row_ids = lax.broadcasted_iota(jnp.int32, (TB, HW_C), 0)
            rows_left = N - (p * n_b + i) * TB   # may be <=0 for fully-OOB tiles
            valid = row_ids < rows_left
        if mask_cols:
            col_ids = lax.broadcasted_iota(jnp.int32, (TB, HW_C), 1)
            cmask = col_ids < (HW - j * HW_C)
            valid = cmask if valid is None else (valid & cmask)
        # where (not multiply) so NaN/Inf garbage in padded regions is dropped.
        num = jnp.where(valid, num, 0.0)
        w = jnp.where(valid, w, 0.0)

    loss_acc[...] += jnp.sum(num, keepdims=True)
    mask_acc[...] += jnp.sum(w, keepdims=True)

    @pl.when((i == n_b - 1) & (j == n_c - 1))
    def _finalize():
        loss_out_ref[0] = loss_acc[...]
        mask_out_ref[0] = mask_acc[...]


def offset_pos_loss(offset_pred, offset_label):
    """offset_pred: (N, 2, H, W), offset_label: (N, 3, H, W) -> scalar f32."""
    N, C, H, W = offset_pred.shape
    assert C == 2 and offset_label.shape[1] == 3
    HW = H * W

    # Free, contiguous reshapes only — no channel-split copies in the wrapper.
    pred = offset_pred.reshape(N, 2, HW)
    label = offset_label.reshape(N, 3, HW)

    # ---- per-generation VMEM sizing ---------------------------------------
    try:
        vmem_cap = int(getattr(pltpu.get_tpu_info(), "vmem_capacity_bytes", 0))
    except Exception:
        vmem_cap = 0
    if vmem_cap <= 0:
        vmem_cap = 64 * 1024 * 1024                     # conservative (v7x per-TC)
    vmem_cap = min(vmem_cap, 128 * 1024 * 1024)
    vmem_limit = max(32 * 1024 * 1024, vmem_cap - 8 * 1024 * 1024)
    budget = int(vmem_limit * 0.7)                      # tiles + working temporaries

    isz_p = offset_pred.dtype.itemsize
    isz_l = offset_label.dtype.itemsize

    def per_row_bytes(hw_c):
        # 2/3-channel dim is padded to 8 sublanes in the VMEM tile layout.
        inputs = 2 * 8 * (isz_p + isz_l) * hw_c         # double-buffered input tiles
        temps = 12 * 4 * hw_c                           # f32 elementwise temporaries
        return inputs + temps

    # Lane (HW) tiling only if even an 8-row tile at full HW would not fit.
    if HW <= 128 or per_row_bytes(HW) * 8 <= budget:
        HW_C = HW
    else:
        HW_C = max(128, ((budget // (8 * per_row_bytes(1))) // 128) * 128)
        HW_C = min(HW_C, HW)
    n_c = -(-HW // HW_C)

    # Batch tile: big enough to amortize per-step overhead, small enough to
    # leave ~8 row-tiles (pipelining + 2-TC split), capped by the VMEM budget.
    tb_cap = max(8, ((budget // per_row_bytes(HW_C)) // 8) * 8)
    tb_target = -(-N // 8)
    TB = max(8, ((tb_target + 7) // 8) * 8)
    TB = min(TB, tb_cap)
    if TB > N:
        TB = N                                          # tiny batch: single exact tile

    n_row_tiles = -(-N // TB)
    P = 2 if n_row_tiles >= 2 else 1                    # row-tile split across cores
    n_b = -(-n_row_tiles // P)

    mask_rows = (P * n_b * TB) != N
    mask_cols = (n_c * HW_C) != HW

    kernel = functools.partial(
        _offset_pos_kernel, N=N, HW=HW, TB=TB, HW_C=HW_C,
        n_b=n_b, n_c=n_c, mask_rows=mask_rows, mask_cols=mask_cols)

    def in_map(p, i, j):
        # Clamp so a fully out-of-range row tile (when P*n_b > n_row_tiles)
        # re-reads the last valid tile; the in-kernel row mask zeroes it.
        return (jnp.minimum(p * n_b + i, n_row_tiles - 1), 0, j)

    def out_map(p, i, j):
        return (p, 0, 0)

    loss_parts, mask_parts = pl.pallas_call(
        kernel,
        out_shape=(jax.ShapeDtypeStruct((P, 1, 1), jnp.float32),
                   jax.ShapeDtypeStruct((P, 1, 1), jnp.float32)),
        grid_spec=pltpu.PrefetchScalarGridSpec(
            num_scalar_prefetch=0,
            grid=(P, n_b, n_c),
            in_specs=[
                pl.BlockSpec((TB, 2, HW_C), in_map),
                pl.BlockSpec((TB, 3, HW_C), in_map),
            ],
            out_specs=[
                pl.BlockSpec((1, 1, 1), out_map),
                pl.BlockSpec((1, 1, 1), out_map),
            ],
            scratch_shapes=[
                pltpu.VMEM((1, 1), jnp.float32),   # loss partial accumulator
                pltpu.VMEM((1, 1), jnp.float32),   # mask (weight) partial accumulator
            ],
        ),
        compiler_params=pltpu.CompilerParams(
            dimension_semantics=("parallel", "arbitrary", "arbitrary"),
            vmem_limit_bytes=vmem_limit,
        ),
    )(pred, label)

    loss_sum = jnp.sum(loss_parts)
    mask_sum = jnp.sum(mask_parts)
    return loss_sum / jnp.maximum(jnp.float32(1.0), mask_sum)


def _reference(offset_pred, offset_label):
    diff = offset_pred - offset_label[:, :2, :, :]
    absd = jnp.abs(diff)
    sl1 = jnp.where(absd < 1.0, 0.5 * diff * diff, absd - 0.5)
    mask = offset_label[:, 2, :, :][:, None, :, :]
    loss_sum = jnp.sum(mask * sl1)
    return loss_sum / jnp.maximum(1.0, jnp.sum(offset_label[:, 2, :, :]))


if __name__ == "__main__":
    key = jax.random.PRNGKey(0)
    k1, k2, k3 = jax.random.split(key, 3)

    # N=10 exercises multiple row tiles, the parallel split, and ragged-row masking.
    N, H, W = 10, 16, 16
    offset_pred = jax.random.normal(k1, (N, 2, H, W), dtype=jnp.float32)
    # label: channels 0,1 = target offsets; channel 2 = positive-sample weights
    offsets = jax.random.normal(k2, (N, 2, H, W), dtype=jnp.float32)
    weights = (jax.random.uniform(k3, (N, 1, H, W)) > 0.8).astype(jnp.float32)
    offset_label = jnp.concatenate([offsets, weights], axis=1)  # (N, 3, H, W)

    out = jax.block_until_ready(offset_pos_loss(offset_pred, offset_label))
    ref = jax.block_until_ready(_reference(offset_pred, offset_label))
    assert jnp.allclose(out, ref, rtol=1e-5, atol=1e-5), (out, ref)

    print("KERNEL_OK")
</pallas_src>

<mosaic_0001>
module attributes {stable_mosaic.version = 11 : i64} {
  func.func @_offset_pos_kernel(%arg0: i32, %arg1: i32, %arg2: i32, %arg3: memref<8x2x256xf32, #tpu.memory_space<vmem>>, %arg4: memref<8x3x256xf32, #tpu.memory_space<vmem>>, %arg5: memref<1x1x1xf32, #tpu.memory_space<vmem>>, %arg6: memref<1x1x1xf32, #tpu.memory_space<vmem>>, %arg7: memref<1x1xf32, #tpu.memory_space<vmem>>, %arg8: memref<1x1xf32, #tpu.memory_space<vmem>>) attributes {dimension_semantics = [#tpu.dimension_semantics<parallel>, #tpu.dimension_semantics<arbitrary>, #tpu.dimension_semantics<arbitrary>], iteration_bounds = array<i64: 2, 1, 1>, scalar_prefetch = 0 : i64, scratch_operands = 2 : i64, tpu.core_type = #tpu.core_type<tc>, window_params = [{transform_indices = @transform_0, window_bounds = array<i64: 8, 2, 256>}, {transform_indices = @transform_1, window_bounds = array<i64: 8, 3, 256>}, {transform_indices = @transform_2, window_bounds = array<i64: 1, 1, 1>}, {transform_indices = @transform_3, window_bounds = array<i64: 1, 1, 1>}]} {
    %c0_i32 = arith.constant 0 : i32
    %0 = arith.cmpi eq, %arg1, %c0_i32 : i32
    %c0_i32_0 = arith.constant 0 : i32
    %1 = arith.cmpi eq, %arg2, %c0_i32_0 : i32
    %2 = arith.andi %0, %1 : i1
    %3 = arith.extui %2 : i1 to i32
    %c0_i32_1 = arith.constant 0 : i32
    %4 = arith.cmpi ne, %3, %c0_i32_1 : i32
    scf.if %4 {
      %cst_34 = arith.constant 0.000000e+00 : f32
      %69 = vector.broadcast %cst_34 : f32 to vector<1x1xf32>
      %c0_35 = arith.constant 0 : index
      %c0_36 = arith.constant 0 : index
      %70 = vector.load %arg7[%c0_35, %c0_36] : memref<1x1xf32, #tpu.memory_space<vmem>>, vector<1x1xf32>
      tpu.vector_store %arg7[%c0_35, %c0_36], %69 {strides = array<i32>} : memref<1x1xf32, #tpu.memory_space<vmem>>, vector<1x1xf32>,
      %cst_37 = arith.constant 0.000000e+00 : f32
      %71 = vector.broadcast %cst_37 : f32 to vector<1x1xf32>
      %c0_38 = arith.constant 0 : index
      %c0_39 = arith.constant 0 : index
      %72 = vector.load %arg8[%c0_38, %c0_39] : memref<1x1xf32, #tpu.memory_space<vmem>>, vector<1x1xf32>
      tpu.vector_store %arg8[%c0_38, %c0_39], %71 {strides = array<i32>} : memref<1x1xf32, #tpu.memory_space<vmem>>, vector<1x1xf32>,
    } else {
    }
    %c0 = arith.constant 0 : index
    %c0_2 = arith.constant 0 : index
    %c0_3 = arith.constant 0 : index
    %5 = vector.load %arg3[%c0, %c0_2, %c0_3] : memref<8x2x256xf32, #tpu.memory_space<vmem>>, vector<8x1x256xf32>
    %6 = vector.shape_cast %5 : vector<8x1x256xf32> to vector<8x256xf32>
    %c0_4 = arith.constant 0 : index
    %c1 = arith.constant 1 : index
    %c0_5 = arith.constant 0 : index
    %7 = vector.load %arg3[%c0_4, %c1, %c0_5] : memref<8x2x256xf32, #tpu.memory_space<vmem>>, vector<8x1x256xf32>
    %8 = vector.shape_cast %7 : vector<8x1x256xf32> to vector<8x256xf32>
    %c0_6 = arith.constant 0 : index
    %c0_7 = arith.constant 0 : index
    %c0_8 = arith.constant 0 : index
    %9 = vector.load %arg4[%c0_6, %c0_7, %c0_8] : memref<8x3x256xf32, #tpu.memory_space<vmem>>, vector<8x1x256xf32>
    %10 = vector.shape_cast %9 : vector<8x1x256xf32> to vector<8x256xf32>
    %c0_9 = arith.constant 0 : index
    %c1_10 = arith.constant 1 : index
    %c0_11 = arith.constant 0 : index
    %11 = vector.load %arg4[%c0_9, %c1_10, %c0_11] : memref<8x3x256xf32, #tpu.memory_space<vmem>>, vector<8x1x256xf32>
    %12 = vector.shape_cast %11 : vector<8x1x256xf32> to vector<8x256xf32>
    %c0_12 = arith.constant 0 : index
    %c2 = arith.constant 2 : index
    %c0_13 = arith.constant 0 : index
    %13 = vector.load %arg4[%c0_12, %c2, %c0_13] : memref<8x3x256xf32, #tpu.memory_space<vmem>>, vector<8x1x256xf32>
    %14 = vector.shape_cast %13 : vector<8x1x256xf32> to vector<8x256xf32>
    %15 = arith.subf %6, %10 : vector<8x256xf32>
    %16 = arith.subf %8, %12 : vector<8x256xf32>
    %17 = math.absf %15 : vector<8x256xf32>
    %18 = math.absf %16 : vector<8x256xf32>
    %cst = arith.constant 1.000000e+00 : f32
    %19 = vector.broadcast %cst : f32 to vector<8x256xf32>
    %20 = arith.cmpf olt, %17, %19 : vector<8x256xf32>
    %cst_14 = arith.constant 5.000000e-01 : f32
    %21 = vector.broadcast %cst_14 : f32 to vector<8x256xf32>
    %22 = arith.mulf %21, %15 : vector<8x256xf32>
    %23 = arith.mulf %22, %15 : vector<8x256xf32>
    %cst_15 = arith.constant 5.000000e-01 : f32
    %24 = vector.broadcast %cst_15 : f32 to vector<8x256xf32>
    %25 = arith.subf %17, %24 : vector<8x256xf32>
    %26 = arith.select %20, %23, %25 : vector<8x256xi1>, vector<8x256xf32>
    %cst_16 = arith.constant 1.000000e+00 : f32
    %27 = vector.broadcast %cst_16 : f32 to vector<8x256xf32>
    %28 = arith.cmpf olt, %18, %27 : vector<8x256xf32>
    %cst_17 = arith.constant 5.000000e-01 : f32
    %29 = vector.broadcast %cst_17 : f32 to vector<8x256xf32>
    %30 = arith.mulf %29, %16 : vector<8x256xf32>
    %31 = arith.mulf %30, %16 : vector<8x256xf32>
    %cst_18 = arith.constant 5.000000e-01 : f32
    %32 = vector.broadcast %cst_18 : f32 to vector<8x256xf32>
    %33 = arith.subf %18, %32 : vector<8x256xf32>
    %34 = arith.select %28, %31, %33 : vector<8x256xi1>, vector<8x256xf32>
    %35 = arith.addf %26, %34 : vector<8x256xf32>
    %36 = arith.mulf %14, %35 : vector<8x256xf32>
    %37 = tpu.iota {dimensions = array<i32: 0>} : vector<8x256xi32>
    %c1_i32 = arith.constant 1 : i32
    %38 = arith.muli %arg0, %c1_i32 : i32
    %39 = arith.addi %38, %arg1 : i32
    %c8_i32 = arith.constant 8 : i32
    %40 = arith.muli %39, %c8_i32 : i32
    %c10_i32 = arith.constant 10 : i32
    %41 = arith.subi %c10_i32, %40 : i32
    %42 = vector.broadcast %41 : i32 to vector<8x256xi32>
    %43 = arith.cmpi slt, %37, %42 : vector<8x256xi32>
    %cst_19 = arith.constant 0.000000e+00 : f32
    %44 = vector.broadcast %cst_19 : f32 to vector<8x256xf32>
    %45 = arith.select %43, %36, %44 : vector<8x256xi1>, vector<8x256xf32>
    %cst_20 = arith.constant 0.000000e+00 : f32
    %46 = vector.broadcast %cst_20 : f32 to vector<8x256xf32>
    %47 = arith.select %43, %14, %46 : vector<8x256xi1>, vector<8x256xf32>
    %c0_21 = arith.constant 0 : index
    %c0_22 = arith.constant 0 : index
    %48 = vector.load %arg7[%c0_21, %c0_22] : memref<1x1xf32, #tpu.memory_space<vmem>>, vector<1x1xf32>
    %49 = vector.shape_cast %45 : vector<8x256xf32> to vector<1x8x256xf32>
    %cst_23 = arith.constant dense<0.000000e+00> : vector<1xf32>
    %50 = vector.multi_reduction <add>, %49, %cst_23 [1, 2] : vector<1x8x256xf32> to vector<1xf32>
    %51 = vector.shape_cast %50 : vector<1xf32> to vector<1x1x1xf32>
    %52 = vector.extract %51[0, 0, 0] : f32 from vector<1x1x1xf32>
    %53 = vector.broadcast %52 : f32 to vector<1x1xf32>
    %54 = arith.addf %48, %53 : vector<1x1xf32>
    %c0_24 = arith.constant 0 : index
    %c0_25 = arith.constant 0 : index
    %55 = vector.load %arg7[%c0_24, %c0_25] : memref<1x1xf32, #tpu.memory_space<vmem>>, vector<1x1xf32>
    tpu.vector_store %arg7[%c0_24, %c0_25], %54 {strides = array<i32>} : memref<1x1xf32, #tpu.memory_space<vmem>>, vector<1x1xf32>,
    %c0_26 = arith.constant 0 : index
    %c0_27 = arith.constant 0 : index
    %56 = vector.load %arg8[%c0_26, %c0_27] : memref<1x1xf32, #tpu.memory_space<vmem>>, vector<1x1xf32>
    %57 = vector.shape_cast %47 : vector<8x256xf32> to vector<1x8x256xf32>
    %cst_28 = arith.constant dense<0.000000e+00> : vector<1xf32>
    %58 = vector.multi_reduction <add>, %57, %cst_28 [1, 2] : vector<1x8x256xf32> to vector<1xf32>
    %59 = vector.shape_cast %58 : vector<1xf32> to vector<1x1x1xf32>
    %60 = vector.extract %59[0, 0, 0] : f32 from vector<1x1x1xf32>
    %61 = vector.broadcast %60 : f32 to vector<1x1xf32>
    %62 = arith.addf %56, %61 : vector<1x1xf32>
    %c0_29 = arith.constant 0 : index
    %c0_30 = arith.constant 0 : index
    %63 = vector.load %arg8[%c0_29, %c0_30] : memref<1x1xf32, #tpu.memory_space<vmem>>, vector<1x1xf32>
    tpu.vector_store %arg8[%c0_29, %c0_30], %62 {strides = array<i32>} : memref<1x1xf32, #tpu.memory_space<vmem>>, vector<1x1xf32>,
    %c0_i32_31 = arith.constant 0 : i32
    %64 = arith.cmpi eq, %arg1, %c0_i32_31 : i32
    %c0_i32_32 = arith.constant 0 : i32
    %65 = arith.cmpi eq, %arg2, %c0_i32_32 : i32
    %66 = arith.andi %64, %65 : i1
    %67 = arith.extui %66 : i1 to i32
    %c0_i32_33 = arith.constant 0 : i32
    %68 = arith.cmpi ne, %67, %c0_i32_33 : i32
    scf.if %68 {
      %c0_34 = arith.constant 0 : index
      %c0_35 = arith.constant 0 : index
      %69 = vector.load %arg7[%c0_34, %c0_35] : memref<1x1xf32, #tpu.memory_space<vmem>>, vector<1x1xf32>
      %c0_36 = arith.constant 0 : index
      %c0_37 = arith.constant 0 : index
      %c0_38 = arith.constant 0 : index
      %70 = vector.load %arg5[%c0_36, %c0_37, %c0_38] : memref<1x1x1xf32, #tpu.memory_space<vmem>>, vector<1x1x1xf32>
      %71 = vector.shape_cast %70 : vector<1x1x1xf32> to vector<1x1xf32>
      %72 = vector.shape_cast %69 : vector<1x1xf32> to vector<1x1x1xf32>
      tpu.vector_store %arg5[%c0_36, %c0_37, %c0_38], %72 {strides = array<i32>} : memref<1x1x1xf32, #tpu.memory_space<vmem>>, vector<1x1x1xf32>,
      %c0_39 = arith.constant 0 : index
      %c0_40 = arith.constant 0 : index
      %73 = vector.load %arg8[%c0_39, %c0_40] : memref<1x1xf32, #tpu.memory_space<vmem>>, vector<1x1xf32>
      %c0_41 = arith.constant 0 : index
      %c0_42 = arith.constant 0 : index
      %c0_43 = arith.constant 0 : index
      %74 = vector.load %arg6[%c0_41, %c0_42, %c0_43] : memref<1x1x1xf32, #tpu.memory_space<vmem>>, vector<1x1x1xf32>
      %75 = vector.shape_cast %74 : vector<1x1x1xf32> to vector<1x1xf32>
      %76 = vector.shape_cast %73 : vector<1x1xf32> to vector<1x1x1xf32>
      tpu.vector_store %arg6[%c0_41, %c0_42, %c0_43], %76 {strides = array<i32>} : memref<1x1x1xf32, #tpu.memory_space<vmem>>, vector<1x1x1xf32>,
    } else {
    }
    return
  }
  func.func @transform_0(%arg0: i32, %arg1: i32, %arg2: i32) -> (i32, i32, i32) {
    %c1_i32 = arith.constant 1 : i32
    %0 = arith.muli %arg0, %c1_i32 : i32
    %1 = arith.addi %0, %arg1 : i32
    %c1_i32_0 = arith.constant 1 : i32
    %2 = arith.minsi %1, %c1_i32_0 : i32
    %c0_i32 = arith.constant 0 : i32
    %c0_i32_1 = arith.constant 0 : i32
    return %2, %c0_i32, %arg2 : i32, i32, i32
  }
  func.func @transform_1(%arg0: i32, %arg1: i32, %arg2: i32) -> (i32, i32, i32) {
    %c1_i32 = arith.constant 1 : i32
    %0 = arith.muli %arg0, %c1_i32 : i32
    %1 = arith.addi %0, %arg1 : i32
    %c1_i32_0 = arith.constant 1 : i32
    %2 = arith.minsi %1, %c1_i32_0 : i32
    %c0_i32 = arith.constant 0 : i32
    %c0_i32_1 = arith.constant 0 : i32
    return %2, %c0_i32, %arg2 : i32, i32, i32
  }
  func.func @transform_2(%arg0: i32, %arg1: i32, %arg2: i32) -> (i32, i32, i32) {
    %c0_i32 = arith.constant 0 : i32
    %c0_i32_0 = arith.constant 0 : i32
    %c0_i32_1 = arith.constant 0 : i32
    return %arg0, %c0_i32, %c0_i32_0 : i32, i32, i32
  }
  func.func @transform_3(%arg0: i32, %arg1: i32, %arg2: i32) -> (i32, i32, i32) {
    %c0_i32 = arith.constant 0 : i32
    %c0_i32_0 = arith.constant 0 : i32
    %c0_i32_1 = arith.constant 0 : i32
    return %arg0, %c0_i32, %c0_i32_0 : i32, i32, i32
  }
}

</mosaic_0001>

<bundles_post_ra>
// kernel: tpu_custom_call.1
= control target key start
LH: loop header
LB: loop body
LE: loop exit
PB: predicated region body
PF: predicated region fallthrough
CT: control target
= control target key end

     0   :  { %9 = vsyncpa [#allocation5], 0  ;;  %s1679_s0 = inlined_call_operand.hbm [shape: f32[10,2,256], index: 0, kind: input, shape index: {}]   ;;  %s1680_s1 = inlined_call_operand.hbm [shape: f32[10,3,256], index: 1, kind: input, shape index: {}]   ;;  %s1681_s2 = inlined_call_operand.vmem [shape: f32[2,1,1], index: 2, kind: output, shape index: {0}]   ;;  %s1682_s3 = inlined_call_operand.vmem [shape: f32[2,1,1], index: 3, kind: output, shape index: {1}]  }
   0x1   :  { %11 = vsyncpa [#allocation5 + $0x1], 0 }
   0x2   :  { %12 = vsyncpa [#allocation7], 0 }
   0x3   :  { %14 = vsyncpa [#allocation7 + $0x1], 0  ;;  %s1142_s12 = smov 0   ;;  %s1144_s13 = smov 0  }
   0x4   :  { %s1146_s14 = smov 0   ;;  %s1148_s15 = smov 0  }
   0x5   :  { %s1150_s16 = smov 0   ;;  %s1152_s17 = smov 0  }
   0x6 LB: > { %s39_s18 = sadd.s32 1, %s1108_s16  ;;  %p44_p1 = scmp.lt.s32.totalorder %s1108_s16, 1  ;;  %s1112_s17 = sphi %s1152_s17, %s20_s17   ;;  %s1108_s16 = sphi %s1150_s16, %s1733_s16   ;;  %s1104_s15 = sphi %s1148_s15, %s1732_s15   ;;  %s1100_s14 = sphi %s1146_s14, %s1731_s14   ;;  %s1096_s13 = sphi %s1144_s13, %s1730_s13   ;;  %s1092_s12 = sphi %s1142_s12, %s1729_s12  }
   0x7   : > { %p41_p0 = scmp.ge.s32.totalorder %s39_s18, 2  ;;  %s854_s19 = sadd.s32 4294967295, %s1112_s17  }
   0x8   : > { %p61_p2 = scmp.ne.s32.totalorder %s1100_s14, %s1096_s13  ;;  %p62_p4 = scmp.eq.s32.totalorder %s1112_s17, 0 }
   0x9   : > { %s1735_s18 = smov (%p41_p0, %s39_s18), 0  ;;  %p67_p5 = scmp.ne.s32.totalorder %s1096_s13, %s1092_s12 }
   0xa   : > { %s1178_s20 = scalar_select %p44_p1, %s1108_s16, 1 }
   0xb   : > { %p47_p3 = scmp.lt.s32.totalorder %s1735_s18, 1  ;;  %p68_p6 = scmp.eq.s32.totalorder %s854_s19, 0 }
   0xc   : > { %p1184_p7 = por %p62_p4, %p61_p2  ;;  %s54_s25 = sadd.s32 1, %s1100_s14 }
   0xd   : > { %s48_s21 = scalar_select %p47_p3, %s1735_s18, 1 }
   0xe   : > { %p1188_p8 = por %p68_p6, %p67_p5  ;;  %p857_p10 = scmp.ge.s32.totalorder %s1112_s17, 2 }
   0xf   : > { %s49_s24 = ssub.s32 %s1178_s20, %s48_s21 }
  0x10   : > { %p52_p9 = scmp.eq.s32.totalorder %s49_s24, 0  ;;  %173 = sbr.rel (%p857_p10) target bundleno = 93 (0x5d), region = 16 }
  0x12   : > { %s1195_s26 = scalar_select %p52_p9, %s1100_s14, %s54_s25  }
  0x17   : > { %176 = sbr.rel (!%p1184_p7) target bundleno = 58 (0x3a), region = 20  ;;  %s177_s27 = sand.u32 (%p1184_p7), 1, %s1100_s14  }
  0x18   : > { %s859_s28 = sshll.u32 (%p1184_p7), %s1178_s20, 3  ;;  %s858_s29 = sshll.u32 (%p1184_p7), %s177_s27, 5 }
  0x19   : > { %s187_s30 = ssub.s32 (%p1184_p7), 10, %s859_s28  ;;  %s1205_s6 = scalar_lea.sflag (%p1184_p7), [#allocation5], %s177_s27 }
  0x1a   : > { %p188_p11 = scmp.lt.s32.totalorder (%p1184_p7), %s187_s30, 8  ;;  %s181_s7 = scalar_lea.vmem (%p1184_p7), [#allocation4], %s858_s29 }
  0x1e   : > { %s1737_s30 = smov (!%p188_p11, %s187_s30), 8 }
  0x1f   : > { %s1202_s4 = sshll.u32 %s1737_s30, 6 }
  0x20   : > { %s193_s5 = ssub.s32 512, %s1202_s4 }
  0x21   : > { %194 = vsyncadd %s1205_s6, %s193_s5  ;;  %p862_p12 = scmp.ne.s32.totalorder %s1202_s4, 0  ;;  %s938_s8 = sshll.u32 %s1178_s20, 9 }
  0x22   : > { %s1213_s11 = scalar_lea.hbm %s1679_s0, %s938_s8  ;;  %s201_s12 = sshll.u32 %s181_s7, 4  ;;  %s1215_s12 = int_to_ptr.vmem [resolvable:$true] %s201_s12 }
  0x23   : > { %s1002_s19 = scalar_lea.hbm %s1213_s11, %s1202_s4  ;;  %s1006_s25 = scalar_lea.hbm %s1679_s0, 640 }
  0x24   : > { %p1003_p13 = scmp.ne.s32.totalorder %s1213_s11, %s1002_s19  ;;  %p1007_p2 = scmp.lt.u32.totalorder %s1213_s11, %s1679_s0 }
  0x25   : > { %p1008_p3 = scmp.lt.u32.totalorder %s1006_s25, %s1002_s19  ;;  %p1010_p5 = scmp.lt.u32.totalorder %s1002_s19, %s1213_s11 }
  0x26   : > { %p1004_p0 = pnand %p1003_p13, %p862_p12 }
  0x27   : > { %p1009_p4 = por %p1008_p3, %p1007_p2 }
  0x28   : > { %p1005_p1 = pneg %p1004_p0 }
  0x29   : > { %p1011_p6 = por %p1010_p5, %p1009_p4 }
  0x2b   : > { %p1012_p9 = pnand %p1011_p6, %p1005_p1 }
  0x2d   : > { %1015 = shalt.err (!%p1012_p9)
}
  0x2e   : > { %s1016_s29 = scalar_lea.vmem %s1215_s12, %s1202_s4  ;;  %s1114_s30 = smov [#allocation4]  }
  0x2f   : > { %p1017_p10 = scmp.ne.s32.totalorder %s1215_s12, %s1016_s29  ;;  %s1020_s5 = sshll.u32 %s1114_s30, 4  ;;  %s1021_s5 = int_to_ptr.vmem [resolvable:$false] %s1020_s5 }
  0x30   : > { %s1022_s7 = scalar_lea.vmem %s1021_s5, 1024  ;;  %p1023_p0 = scmp.lt.s32.totalorder %s1215_s12, %s1021_s5 }
  0x31   : > { %p1018_p11 = pnand %p1017_p10, %p862_p12  ;;  %p1024_p2 = scmp.lt.s32.totalorder %s1022_s7, %s1016_s29 }
  0x33   : > { %p1019_p13 = pneg %p1018_p11  ;;  %p1025_p3 = por %p1024_p2, %p1023_p0 }
  0x35   : > { %p1026_p4 = pnand %p1025_p3, %p1019_p13 }
  0x37   : > { %1029 = shalt.err (!%p1026_p4)
}
  0x38   : > { %s1115_s8 = smov 64   ;;  %s1116_s9 = smov 4  }
  0x39   : > { %207 = dma.hbm_to_vmem [thread:$0]  (%p862_p12), %s1213_s11, %s1202_s4, %s1215_s12, %s1205_s6, %s1115_s8, %s1115_s8, %s1116_s9  }
  0x3a PF: > { %210 = sbr.rel (!%p1184_p7) target bundleno = 93 (0x5d), region = 24  ;;  %s211_s10 = sand.u32 (%p1184_p7), 1, %s1100_s14  }
  0x3b   : > { %s868_s19 = sshll.u32 (%p1184_p7), %s1178_s20, 3  ;;  %s867_s21 = sshll.u32 (%p1184_p7), %s211_s10, 6 }
  0x3c   : > { %s221_s24 = ssub.s32 (%p1184_p7), 10, %s868_s19  ;;  %s1249_s28 = scalar_lea.sflag (%p1184_p7), [#allocation7], %s211_s10 }
  0x3d   : > { %p222_p1 = scmp.lt.s32.totalorder (%p1184_p7), %s221_s24, 8  ;;  %s215_s4 = scalar_lea.vmem (%p1184_p7), [#allocation6], %s867_s21 }
  0x41   : > { %s1739_s24 = smov (!%p222_p1, %s221_s24), 8 }
  0x42   : > { %s1246_s25 = sshll.u32 %s1739_s24, 7 }
  0x43   : > { %s227_s27 = ssub.s32 1024, %s1246_s25 }
  0x44   : > { %228 = vsyncadd %s1249_s28, %s227_s27  ;;  %p871_p7 = scmp.ne.s32.totalorder %s1246_s25, 0  ;;  %s941_s22 = sshll.u32 %s1178_s20, 10 }
  0x45   : > { %s1257_s12 = scalar_lea.hbm %s1680_s1, %s941_s22  ;;  %s235_s29 = sshll.u32 %s215_s4, 4  ;;  %s1259_s29 = int_to_ptr.vmem [resolvable:$true] %s235_s29 }
  0x46   : > { %s1030_s30 = scalar_lea.hbm %s1257_s12, %s1246_s25  ;;  %s1034_s20 = scalar_lea.hbm %s1680_s1, 1280 }
  0x47   : > { %p1031_p12 = scmp.ne.s32.totalorder %s1257_s12, %s1030_s30  ;;  %p1035_p9 = scmp.lt.u32.totalorder %s1257_s12, %s1680_s1 }
  0x48   : > { %p1036_p10 = scmp.lt.u32.totalorder %s1034_s20, %s1030_s30  ;;  %p1038_p13 = scmp.lt.u32.totalorder %s1030_s30, %s1257_s12 }
  0x49   : > { %p1032_p5 = pnand %p1031_p12, %p871_p7 }
  0x4a   : > { %p1037_p11 = por %p1036_p10, %p1035_p9 }
  0x4b   : > { %p1033_p6 = pneg %p1032_p5 }
  0x4c   : > { %p1039_p0 = por %p1038_p13, %p1037_p11 }
  0x4e   : > { %p1040_p2 = pnand %p1039_p0, %p1033_p6 }
  0x50   : > { %1043 = shalt.err (!%p1040_p2)
}
  0x51   : > { %s1044_s10 = scalar_lea.vmem %s1259_s29, %s1246_s25  ;;  %s1117_s19 = smov [#allocation6]  }
  0x52   : > { %p1045_p3 = scmp.ne.s32.totalorder %s1259_s29, %s1044_s10  ;;  %s1048_s21 = sshll.u32 %s1117_s19, 4  ;;  %s1049_s21 = int_to_ptr.vmem [resolvable:$false] %s1048_s21 }
  0x53   : > { %s1050_s24 = scalar_lea.vmem %s1049_s21, 2048  ;;  %p1051_p12 = scmp.lt.s32.totalorder %s1259_s29, %s1049_s21 }
  0x54   : > { %p1046_p4 = pnand %p1045_p3, %p871_p7  ;;  %p1052_p5 = scmp.lt.s32.totalorder %s1050_s24, %s1044_s10 }
  0x56   : > { %p1047_p1 = pneg %p1046_p4  ;;  %p1053_p9 = por %p1052_p5, %p1051_p12 }
  0x58   : > { %p1054_p10 = pnand %p1053_p9, %p1047_p1 }
  0x5a   : > { %1057 = shalt.err (!%p1054_p10)
}
  0x5b   : > { %s1118_s27 = smov 128   ;;  %s1119_s4 = smov 8  }
  0x5c   : > { %241 = dma.hbm_to_vmem [thread:$0]  (%p871_p7), %s1257_s12, %s1246_s25, %s1259_s29, %s1249_s28, %s1118_s27, %s1118_s27, %s1119_s4  }
  0x5d PF: > { %p876_p6 = scmp.ge.s32.totalorder %s1112_s17, 1  ;;  %p243_p11 = scmp.lt.s32.totalorder %s1112_s17, 3 }
  0x5f   : > { %p244_p13 = pnand %p876_p6, %p243_p11 }
  0x60   : > { %s249_s22 = sand.u32 (!%p244_p13), 1, %s1096_s13  }
  0x61   : > { %247 = sbr.rel (%p244_p13) target bundleno = 394 (0x18a), region = 28  ;;  %s877_s6 = sshll.u32 (!%p244_p13), %s249_s22, 5 }
  0x62   : > { %s250_s11 = scalar_lea.sflag (!%p244_p13), [#allocation5], %s249_s22  ;;  %s1289_s30 = scalar_lea.vmem (!%p244_p13), [#allocation4], %s877_s6 }
  0x68   : > { %1083 = dma.done.wait (%p1188_p8), %s250_s11, 512  }
  0x69   : > { %1085 = vsyncadd (%p1188_p8), %s250_s11, 4294966784  ;;  %s878_s25 = sshll.u32 %s249_s22, 6  ;;  %s259_s28 = scalar_lea.sflag [#allocation7], %s249_s22 }
  0x6a   : > { %s1295_s12 = scalar_lea.vmem [#allocation6], %s878_s25 }
  0x6b   : > { %1087 = dma.done.wait (%p1188_p8), %s259_s28, 1024  }
  0x6c   : > { %1089 = vsyncadd (%p1188_p8), %s259_s28, 4294966272  ;;  %v532_v0 = vlaneseq  ;;  %v1120_v1 = vmov 1966171168   ;;  %v326_v4 = vld [vmem:[%s1289_s30] ss:$2 sm:$0x3] }
  0x6d   : > { %v552_v2 = vunpack.c.l.s4 %v1120_v1  ;;  %v879_v5 = vld [vmem:[%s1289_s30 + $0x4] ss:$2 sm:$0x3]  ;;  %v880_v6 = vld [vmem:[%s1289_s30 + $0x8] ss:$2 sm:$0x3] }
  0x6e   : > { %v1301_v3 = vshrl.u32 %v532_v0, 7  ;;  %v881_v7 = vld [vmem:[%s1289_s30 + $0xc] ss:$2 sm:$0x3]  ;;  %s933_s23 = sshll.u32 %s1104_s15, 3  ;;  %p311_p8 = scmp.lt.s32.totalorder %s1104_s15, 1 }
  0x6f   : > { %v357_v8 = vld [vmem:[%s1295_s12] ss:$4 sm:$0x3]  ;;  %v894_v9 = vld [vmem:[%s1295_s12 + $0x8] ss:$4 sm:$0x3]  ;;  %v553_v12 = vunpack.c.0.s8 %v552_v2 }
  0x70   : > { %v895_v10 = vld [vmem:[%s1295_s12 + $0x10] ss:$4 sm:$0x3]  ;;  %v896_v11 = vld [vmem:[%s1295_s12 + $0x18] ss:$4 sm:$0x3]  ;;  %v1338_v38 = vsub.f32 %v326_v4, %v357_v8  ;;  %v1340_v39 = vsub.f32 %v879_v5, %v894_v9 }
  0x71   : > { %v882_v13 = vld [vmem:[%s1289_s30 + $0x10] ss:$2 sm:$0x3]  ;;  %v883_v14 = vld [vmem:[%s1289_s30 + $0x14] ss:$2 sm:$0x3]  ;;  %v1334_v35 = vsub.s32 %v553_v12, %v1301_v3  ;;  %v1342_v40 = vsub.f32 %v880_v6, %v895_v10  ;;  %v1344_v41 = vsub.f32 %v881_v7, %v896_v11 }
  0x72   : > { %v884_v15 = vld [vmem:[%s1289_s30 + $0x18] ss:$2 sm:$0x3]  ;;  %v885_v16 = vld [vmem:[%s1289_s30 + $0x1c] ss:$2 sm:$0x3] }
  0x73   : > { %v897_v17 = vld [vmem:[%s1295_s12 + $0x20] ss:$4 sm:$0x3]  ;;  %v898_v18 = vld [vmem:[%s1295_s12 + $0x28] ss:$4 sm:$0x3] }
  0x74   : > { %v899_v19 = vld [vmem:[%s1295_s12 + $0x30] ss:$4 sm:$0x3]  ;;  %v900_v20 = vld [vmem:[%s1295_s12 + $0x38] ss:$4 sm:$0x3]  ;;  %v1352_v44 = vsub.f32 %v882_v13, %v897_v17  ;;  %v1354_v45 = vsub.f32 %v883_v14, %v898_v18 }
  0x75   : > { %v886_v21 = vld [vmem:[%s1289_s30 + $0x1] ss:$2 sm:$0x3]  ;;  %v887_v22 = vld [vmem:[%s1289_s30 + $0x5] ss:$2 sm:$0x3]  ;;  %v1356_v46 = vsub.f32 %v884_v15, %v899_v19  ;;  %v1358_v47 = vsub.f32 %v885_v16, %v900_v20 }
  0x76   : > { %v888_v23 = vld [vmem:[%s1289_s30 + $0x9] ss:$2 sm:$0x3]  ;;  %v901_v24 = vld [vmem:[%s1295_s12 + $0x1] ss:$4 sm:$0x3] }
  0x77   : > { %v902_v25 = vld [vmem:[%s1295_s12 + $0x9] ss:$4 sm:$0x3]  ;;  %v890_v27 = vld [vmem:[%s1289_s30 + $0x11] ss:$2 sm:$0x3]  ;;  %v1366_v50 = vsub.f32 %v886_v21, %v901_v24 }
  0x78   : > { %v889_v26 = vld [vmem:[%s1289_s30 + $0xd] ss:$2 sm:$0x3]  ;;  %v891_v28 = vld [vmem:[%s1289_s30 + $0x15] ss:$2 sm:$0x3]  ;;  %v1368_v51 = vsub.f32 %v887_v22, %v902_v25 }
  0x79   : > { %v903_v29 = vld [vmem:[%s1295_s12 + $0x11] ss:$4 sm:$0x3]  ;;  %v904_v30 = vld [vmem:[%s1295_s12 + $0x19] ss:$4 sm:$0x3] }
  0x7a   : > { %v892_v31 = vld [vmem:[%s1289_s30 + $0x19] ss:$2 sm:$0x3]  ;;  %v893_v32 = vld [vmem:[%s1289_s30 + $0x1d] ss:$2 sm:$0x3]  ;;  %v1370_v52 = vsub.f32 %v888_v23, %v903_v29  ;;  %v1380_v56 = vsub.f32 %v889_v26, %v904_v30 }
  0x7b   : > { %v905_v33 = vld [vmem:[%s1295_s12 + $0x21] ss:$4 sm:$0x3]  ;;  %v906_v34 = vld [vmem:[%s1295_s12 + $0x29] ss:$4 sm:$0x3] }
  0x7c   : > { %v907_v36 = vld [vmem:[%s1295_s12 + $0x31] ss:$4 sm:$0x3]  ;;  %v908_v37 = vld [vmem:[%s1295_s12 + $0x39] ss:$4 sm:$0x3]  ;;  %v1382_v57 = vsub.f32 %v890_v27, %v905_v33  ;;  %v1384_v58 = vsub.f32 %v891_v28, %v906_v34 }
  0x7d   : > { %v1347_v42 = vld [vmem:[%s1295_s12 + $0x2] ss:$4 sm:$0x3]  ;;  %v1350_v43 = vld [vmem:[%s1295_s12 + $0xa] ss:$4 sm:$0x3]  ;;  %v1394_v62 = vsub.f32 %v892_v31, %v907_v36  ;;  %v1396_v63 = vsub.f32 %v893_v32, %v908_v37 }
  0x7e   : > { %v1361_v48 = vld [vmem:[%s1295_s12 + $0x12] ss:$4 sm:$0x3]  ;;  %v1364_v49 = vld [vmem:[%s1295_s12 + $0x1a] ss:$4 sm:$0x3]  ;;  %v625_v53 = vcombine.low %v1347_v42, %v1350_v43 }
  0x7f   : > { %v1375_v54 = vld [vmem:[%s1295_s12 + $0x22] ss:$4 sm:$0x3]  ;;  %v1378_v55 = vld [vmem:[%s1295_s12 + $0x2a] ss:$4 sm:$0x3]  ;;  %v626_v59 = vcombine.low %v1361_v48, %v1364_v49 }
  0x80   : > { %v1389_v60 = vld [vmem:[%s1295_s12 + $0x32] ss:$4 sm:$0x3]  ;;  %v1392_v61 = vld [vmem:[%s1295_s12 + $0x3a] ss:$4 sm:$0x3]  ;;  %v627_v0 = vcombine.low %v1375_v54, %v1378_v55  ;;  %v1401_v1 = vrot.slane %v625_v53, %v1334_v35 }
  0x81   : > { %v420_v2 = vand.u32 2147483647, %v1338_v38  ;;  %v421_v4 = vand.u32 2147483647, %v1340_v39  ;;  %v422_v5 = vand.u32 2147483647, %v1342_v40  ;;  %v628_v6 = vcombine.low %v1389_v60, %v1392_v61 }
  0x82   : > { %v423_v7 = vand.u32 2147483647, %v1344_v41  ;;  %v424_v8 = vand.u32 2147483647, %v1352_v44  ;;  %v425_v9 = vand.u32 2147483647, %v1354_v45  ;;  %v1412_v10 = vrot.slane %v626_v59, %v1334_v35 }
  0x83   : > { %v426_v11 = vand.u32 2147483647, %v1356_v46  ;;  %v427_v12 = vand.u32 2147483647, %v1358_v47  ;;  %v428_v13 = vand.u32 2147483647, %v1366_v50  ;;  %v1418_v14 = vrot.slane %v627_v0, %v1334_v35 }
  0x84   : > { %v429_v15 = vand.u32 2147483647, %v1368_v51  ;;  %v1424_v18 = vrot.slane %v628_v6, %v1334_v35  ;;  %vm1432_vm0 = vcmp.lt.f32.partialorder %v420_v2, 1.0  ;;  %vm1436_vm1 = vcmp.lt.f32.partialorder %v421_v4, 1.0  ;;  %s536_s29 = ssub.s32 10, %s933_s23  ;;  %s1741_s15 = smov (!%p311_p8, %s1104_s15), 1 }
  0x85   : > { %vm1440_vm2 = vcmp.lt.f32.partialorder %v422_v5, 1.0  ;;  %vm1444_vm3 = vcmp.lt.f32.partialorder %v423_v7, 1.0  ;;  %vm1448_vm4 = vcmp.lt.f32.partialorder %v424_v8, 1.0  ;;  %vm1452_vm5 = vcmp.lt.f32.partialorder %v425_v9, 1.0  ;;  %s313_s9 = scalar_lea.vmem %s1681_s2, %s1741_s15  ;;  %s316_s21 = scalar_lea.vmem %s1682_s3, %s1741_s15 }
  0x86   : > { %vm1456_vm6 = vcmp.lt.f32.partialorder %v426_v11, 1.0  ;;  %vm1460_vm7 = vcmp.lt.f32.partialorder %v427_v12, 1.0  ;;  %v444_v32 = vmul.f32 0.5, %v1338_v38  ;;  %v445_v33 = vmul.f32 0.5, %v1340_v39 }
  0x87   : > { %v446_v34 = vmul.f32 0.5, %v1342_v40  ;;  %v447_v36 = vmul.f32 0.5, %v1344_v41  ;;  %v448_v37 = vmul.f32 0.5, %v1352_v44  ;;  %v449_v53 = vmul.f32 0.5, %v1354_v45 }
  0x88   : > { %v450_v59 = vmul.f32 0.5, %v1356_v46  ;;  %v451_v0 = vmul.f32 0.5, %v1358_v47  ;;  %v1473_v6 = vmul.f32 %v444_v32, %v1338_v38  ;;  %v1476_v22 = vmul.f32 %v445_v33, %v1340_v39 }
  0x89   : > { %v1479_v23 = vmul.f32 %v446_v34, %v1342_v40  ;;  %v1482_v21 = vmul.f32 %v447_v36, %v1344_v41  ;;  %v1485_v20 = vmul.f32 %v448_v37, %v1352_v44  ;;  %v1488_v19 = vmul.f32 %v449_v53, %v1354_v45 }
  0x8a   : > { %v1491_v17 = vmul.f32 %v450_v59, %v1356_v46  ;;  %v1494_v38 = vmul.f32 %v451_v0, %v1358_v47  ;;  %v917_v39 = vadd.f32 -0.5, %v420_v2  ;;  %v918_v32 = vadd.f32 -0.5, %v421_v4 }
  0x8b   : > { %v919_v33 = vadd.f32 -0.5, %v422_v5  ;;  %v920_v40 = vadd.f32 -0.5, %v423_v7  ;;  %v921_v34 = vadd.f32 -0.5, %v424_v8  ;;  %v922_v16 = vadd.f32 -0.5, %v425_v9 }
  0x8c   : > { %v923_v41 = vadd.f32 -0.5, %v426_v11  ;;  %v924_v36 = vadd.f32 -0.5, %v427_v12  ;;  %v468_v44 = vsel %vm1432_vm0, %v1473_v6, %v917_v39  ;;  %v469_v45 = vsel %vm1436_vm1, %v1476_v22, %v918_v32 }
  0x8d   : > { %v470_v46 = vsel %vm1440_vm2, %v1479_v23, %v919_v33  ;;  %v471_v47 = vsel %vm1444_vm3, %v1482_v21, %v920_v40  ;;  %v472_v2 = vsel %vm1448_vm4, %v1485_v20, %v921_v34  ;;  %v473_v4 = vsel %vm1452_vm5, %v1488_v19, %v922_v16 }
  0x8e   : > { %v474_v5 = vsel %vm1456_vm6, %v1491_v17, %v923_v41  ;;  %v475_v7 = vsel %vm1460_vm7, %v1494_v38, %v924_v36  ;;  %vm1522_vm8 = vcmp.lt.f32.partialorder %v428_v13, 1.0  ;;  %vm1528_vm9 = vcmp.lt.f32.partialorder %v429_v15, 1.0 }
  0x8f   : > { %v1705_v11 = vand.u32 2147483647, %v1370_v52  ;;  %v1708_v16 = vand.u32 2147483647, %v1380_v56  ;;  %v1711_v19 = vand.u32 2147483647, %v1382_v57 }
  0x90   : > { %v1714_v21 = vand.u32 2147483647, %v1384_v58  ;;  %v1717_v23 = vand.u32 2147483647, %v1394_v62  ;;  %v1720_v25 = vand.u32 2147483647, %v1396_v63 }
  0x91   : > { %vm1534_vm10 = vcmp.lt.f32.partialorder %v1705_v11, 1.0  ;;  %vm1540_vm11 = vcmp.lt.f32.partialorder %v1708_v16, 1.0  ;;  %vm1546_vm12 = vcmp.lt.f32.partialorder %v1711_v19, 1.0  ;;  %v484_v27 = vmul.f32 0.5, %v1366_v50 }
  0x92   : > { %vm1552_vm13 = vcmp.lt.f32.partialorder %v1714_v21, 1.0  ;;  %vm1558_vm14 = vcmp.lt.f32.partialorder %v1717_v23, 1.0  ;;  %vm1564_vm15 = vcmp.lt.f32.partialorder %v1720_v25, 1.0  ;;  %v485_v28 = vmul.f32 0.5, %v1368_v51 }
  0x93   : > { %v486_v29 = vmul.f32 0.5, %v1370_v52  ;;  %v487_v30 = vmul.f32 0.5, %v1380_v56  ;;  %v488_v31 = vmul.f32 0.5, %v1382_v57  ;;  %v489_v37 = vmul.f32 0.5, %v1384_v58 }
  0x94   : > { %v490_v53 = vmul.f32 0.5, %v1394_v62  ;;  %v491_v59 = vmul.f32 0.5, %v1396_v63  ;;  %v492_v0 = vmul.f32 %v484_v27, %v1366_v50  ;;  %v493_v6 = vmul.f32 %v485_v28, %v1368_v51 }
  0x95   : > { %v494_v38 = vmul.f32 %v486_v29, %v1370_v52  ;;  %v495_v39 = vmul.f32 %v487_v30, %v1380_v56  ;;  %v496_v32 = vmul.f32 %v488_v31, %v1382_v57  ;;  %v497_v33 = vmul.f32 %v489_v37, %v1384_v58 }
  0x96   : > { %v498_v40 = vmul.f32 %v490_v53, %v1394_v62  ;;  %v499_v34 = vmul.f32 %v491_v59, %v1396_v63  ;;  %v925_v41 = vadd.f32 -0.5, %v428_v13  ;;  %v926_v36 = vadd.f32 -0.5, %v429_v15 }
  0x97   : > { %v927_v16 = vadd.f32 -0.5, %v1705_v11  ;;  %v1723_v19 = vand.u32 2147483647, %v1380_v56  ;;  %v1724_v23 = vand.u32 2147483647, %v1382_v57  ;;  %vm323_vm1 = vcmask 0  }
  0x98   : > { %v1725_v27 = vand.u32 2147483647, %v1384_v58  ;;  %v1726_v29 = vand.u32 2147483647, %v1394_v62  ;;  %v1727_v50 = vand.u32 2147483647, %v1396_v63  ;;  %v508_v51 = vsel %vm1522_vm8, %v492_v0, %v925_v41 }
  0x99   : > { %v928_v21 = vadd.f32 -0.5, %v1723_v19  ;;  %v929_v25 = vadd.f32 -0.5, %v1724_v23  ;;  %v509_v52 = vsel %vm1528_vm9, %v493_v6, %v926_v36  ;;  %v510_v56 = vsel %vm1534_vm10, %v494_v38, %v927_v16 }
  0x9a   : > { %v930_v28 = vadd.f32 -0.5, %v1725_v27  ;;  %v931_v30 = vadd.f32 -0.5, %v1726_v29  ;;  %v932_v13 = vadd.f32 -0.5, %v1727_v50  ;;  %v516_v8 = vadd.f32 %v508_v51, %v468_v44 }
  0x9b   : > { %v511_v57 = vsel %vm1540_vm11, %v495_v39, %v928_v21  ;;  %v512_v58 = vsel %vm1546_vm12, %v496_v32, %v929_v25  ;;  %v517_v9 = vadd.f32 %v509_v52, %v469_v45  ;;  %v518_v12 = vadd.f32 %v510_v56, %v470_v46 }
  0x9c   : > { %v513_v62 = vsel %vm1552_vm13, %v497_v33, %v930_v28  ;;  %v514_v63 = vsel %vm1558_vm14, %v498_v40, %v931_v30  ;;  %v515_v15 = vsel %vm1564_vm15, %v499_v34, %v932_v13  ;;  %v519_v31 = vadd.f32 %v511_v57, %v471_v47 }
  0x9d   : > { %v520_v37 = vadd.f32 %v512_v58, %v472_v2  ;;  %v521_v17 = vadd.f32 %v513_v62, %v473_v4  ;;  %v522_v53 = vadd.f32 %v514_v63, %v474_v5  ;;  %v523_v59 = vadd.f32 %v515_v15, %v475_v7 }
  0x9e   : > { %v524_v20 = vmul.f32 %v1347_v42, %v516_v8  ;;  %v525_v22 = vmul.f32 %v1350_v43, %v517_v9  ;;  %v526_v0 = vmul.f32 %v1361_v48, %v518_v12  ;;  %v527_v24 = vmul.f32 %v1364_v49, %v519_v31 }
  0x9f   : > { %v528_v26 = vmul.f32 %v1375_v54, %v520_v37  ;;  %v529_v44 = vmul.f32 %v1378_v55, %v521_v17  ;;  %v530_v45 = vmul.f32 %v1389_v60, %v522_v53  ;;  %v531_v46 = vmul.f32 %v1392_v61, %v523_v59 }
  0xa0   : > { %v547_v47 = vcombine.low %v524_v20, %v525_v22  ;;  %v658_v2 = vcombine.high %v1401_v1, %v1412_v10  ;;  %v659_v42 = vcombine.low %v1418_v14, %v1424_v18  ;;  %v548_v43 = vcombine.low %v526_v0, %v527_v24 }
  0xa1   : > { %v549_v48 = vcombine.low %v528_v26, %v529_v44  ;;  %v660_v49 = vcombine.high %v1418_v14, %v1424_v18  ;;  %v550_v54 = vcombine.low %v530_v45, %v531_v46  ;;  %v1728_v4 = vcombine.low %v1401_v1, %v1412_v10 }
  0xa2   : > { %v557_v55 = vrot.slane %v547_v47, %v1334_v35  ;;  %v564_v60 = vrot.slane %v548_v43, %v1334_v35  ;;  %v674_v6 = vrot.slane %v658_v2, %v1334_v35  ;;  %v681_v38 = vrot.slane %v659_v42, %v1334_v35 }
  0xa3   : > { %v571_v61 = vrot.slane %v549_v48, %v1334_v35  ;;  %v667_v5 = vrot.slane %v1728_v4, %v1334_v35  ;;  %v578_v7 = vrot.slane %v550_v54, %v1334_v35  ;;  %v688_v14 = vrot.slane %v660_v49, %v1334_v35 }
  0xa4   : > { %v579_v18 = vcombine.low %v557_v55, %v564_v60  ;;  %v580_v39 = vcombine.high %v557_v55, %v564_v60  ;;  %v537_v32 = vstv %s536_s29  ;;  %v1121_v30 = vmov 0.0  }
  0xa5   : > { %v581_v33 = vcombine.low %v571_v61, %v578_v7  ;;  %v582_v40 = vcombine.high %v571_v61, %v578_v7  ;;  %v689_v36 = vcombine.low %v667_v5, %v681_v38  ;;  %v690_v11 = vcombine.low %v674_v6, %v688_v14  ;;  %324 = vst.msk [vmem:[#allocation2] sm:$0x1] %vm323_vm1, %v1121_v30 }
  0xa6   : > { %v589_v34 = vrot.slane %v579_v18, %v1334_v35  ;;  %v596_v41 = vrot.slane %v580_v39, %v1334_v35  ;;  %vm538_vm0 = vcmp.lt.s32.totalorder %v1301_v3, %v537_v32  ;;  %325 = vst.msk [vmem:[#allocation3] sm:$0x1] %vm323_vm1, %v1121_v30 }
  0xa7   : > { %v603_v1 = vrot.slane %v581_v33, %v1334_v35  ;;  %v610_v10 = vrot.slane %v582_v40, %v1334_v35  ;;  %v693_v25 = vsel %vm538_vm0, %v689_v36, 0.0  ;;  %v694_v27 = vsel %vm538_vm0, %v690_v11, 0.0 }
  0xa8   : > { %v711_v29 = vadd.f32 %v694_v27, %v693_v25 }
  0xa9   : > { %v611_v16 = vcombine.low %v589_v34, %v603_v1  ;;  %v612_v19 = vcombine.low %v596_v41, %v610_v10 }
  0xab   : > { %v615_v21 = vsel %vm538_vm0, %v611_v16, 0.0  ;;  %v616_v23 = vsel %vm538_vm0, %v612_v19, 0.0 }
  0xac   : > { %v696_v28 = vadd.f32 %v616_v23, %v615_v21  ;;  %v695_v12 = vld [vmem:[#allocation2] sm:$0x1] }
  0xad   : > { %v710_v17 = vld [vmem:[#allocation3] sm:$0x1] }
  0xae   : > { %697 = vadd.xlane.f32.xlu0 %v696_v28 }
  0xb2   : > { %712 = vadd.xlane.f32.xlu0 %v711_v29 }
 0x13b   : > { %v698_v35 = vpop.xlane.xlu0 %697 }
 0x13c   : > { %v699_v50 = vrot.slane %v698_v35, 4 }
 0x13e   : > { %v700_v13 = vadd.f32 %v699_v50, %v698_v35 }
 0x13f   : > { %v713_v3 = vpop.xlane.xlu0 %712 }
 0x140   : > { %v701_v51 = vrot.slane %v700_v13, 2  ;;  %v714_v52 = vrot.slane %v713_v3, 4 }
 0x142   : > { %v715_v56 = vadd.f32 %v714_v52, %v713_v3  ;;  %v702_v57 = vadd.f32 %v701_v51, %v700_v13 }
 0x144   : > { %v716_v58 = vrot.slane %v715_v56, 2  ;;  %v703_v62 = vrot.slane %v702_v57, 1 }
 0x146   : > { %v717_v63 = vadd.f32 %v716_v58, %v715_v56  ;;  %v704_v15 = vadd.f32 %v703_v62, %v702_v57 }
 0x148   : > { %942 = vpush %v704_v15  ;;  %v718_v8 = vrot.slane %v717_v63, 1 }
 0x14a   : > { %v719_v9 = vadd.f32 %v718_v8, %v717_v63 }
 0x14c   : > { %944 = vpush %v719_v9 }
 0x179   : > { %s943_s5 = spop %942 }
 0x17a   : > { %v706_v31 = vstv %s943_s5 }
 0x17b   : > { %v707_v37 = vadd.f32 %v706_v31, %v695_v12 }
 0x17d   : > { %709 = vst.msk [vmem:[#allocation2] sm:$0x1] %vm323_vm1, %v707_v37  ;;  %s945_s7 = spop %944 }
 0x17e   : > { %v721_v53 = vstv %s945_s7 }
 0x17f   : > { %v722_v59 = vadd.f32 %v721_v53, %v710_v17 }
 0x181   : > { %723 = vst.msk [vmem:[#allocation3] sm:$0x1] %vm323_vm1, %v722_v59 }
 0x184   : > { %v726_v20 = vld [vmem:[#allocation2] sm:$0x1] }
 0x185   : > { %727 = vst.msk [vmem:[%s313_s9] sm:$0x1] %vm323_vm1, %v726_v20 }
 0x188   : > { %v728_v22 = vld [vmem:[#allocation3] sm:$0x1] }
 0x189   : > { %729 = vst.msk [vmem:[%s316_s21] sm:$0x1] %vm323_vm1, %v728_v22 }
 0x18a PF: > { %s20_s17 = sadd.s32 1, %s1112_s17   ;;  %s1729_s12 = smov %s1096_s13 }
 0x18b   : > { %p17_p7 = scmp.ge.s32.totalorder %s20_s17, 4   ;;  %s1730_s13 = smov %s1100_s14 }
 0x18c   : > { %s1731_s14 = smov %s1195_s26  ;;  %s1732_s15 = smov %s1108_s16 }
 0x18d   : > { %s1733_s16 = smov %s1735_s18  ;;  %19 = sbr.rel (!%p17_p7) target bundleno = 6 (0x6), region = 139 }
 0x194   :  { %759 = vsyncpa [#allocation5], 1 }
 0x195   :  { %761 = vsyncpa [#allocation5 + $0x1], 1 }
 0x196   :  { %762 = vsyncpa [#allocation7], 1 }
 0x197   :  { %764 = vsyncpa [#allocation7 + $0x1], 1 }

</bundles_post_ra>
